<compile_context>
chip_gen: v6e
topology: v6e:2x2x1
jax: 0.10.0
libtpu: 0.0.40
codegen_flags: <defaults>
</compile_context>

<pallas_src>
import functools

import jax
import jax.numpy as jnp
from jax.experimental import pallas as pl
from jax.experimental.pallas import tpu as pltpu

# ---- model hyperparameters (small, consistent with the module) ----
DIM = 32          # embedding dim
HEADS = 4
DIM_HEAD = 8
INNER = HEADS * DIM_HEAD   # 32
SCALE = DIM_HEAD ** (-0.5)
STEP = 0.1        # ista step size
LAMBD = 5.0
EPS = 1e-5        # torch LayerNorm default


def _layernorm(v, g, b):
    mu = jnp.mean(v, axis=-1, keepdims=True)
    var = jnp.mean(jnp.square(v - mu), axis=-1, keepdims=True)
    return (v - mu) * jax.lax.rsqrt(var + EPS) * g + b


def crate_block_kernel(n_tok, x_ref, ln1_g_ref, ln1_b_ref, wqkv_h_ref,
                       wo_h_ref, bo_ref, ln2_g_ref, ln2_b_ref, wf_ref,
                       wf_t_ref, o_ref):
    rows = x_ref.shape[0]            # BT * n_tok token rows in this tile
    bt = rows // n_tok

    x = x_ref[...]                                           # (rows, D) f32

    # ---- PreNorm + Attention (shared q = k = v projection) ----
    xn = _layernorm(x, ln1_g_ref[...], ln1_b_ref[...])

    # Accumulate residual + to_out bias + per-head output projections.
    grad_x = x + bo_ref[...]
    for h in range(HEADS):                                   # static unroll (4)
        # head-h qkv projection: (rows, D) @ (D, dh)
        wh = jnp.dot(xn, wqkv_h_ref[h],
                     preferred_element_type=jnp.float32)     # (rows, dh)
        wh3 = wh.reshape(bt, n_tok, DIM_HEAD)                # leading split
        dots = jnp.einsum('bnd,bmd->bnm', wh3, wh3,
                          preferred_element_type=jnp.float32) * SCALE
        m = jnp.max(dots, axis=-1, keepdims=True)
        e = jnp.exp(dots - m)
        attn = e / jnp.sum(e, axis=-1, keepdims=True)
        out_h = jnp.einsum('bnm,bmd->bnd', attn, wh3,
                           preferred_element_type=jnp.float32)
        grad_x = grad_x + jnp.dot(out_h.reshape(rows, DIM_HEAD), wo_h_ref[h],
                                  preferred_element_type=jnp.float32)

    # ---- PreNorm + FeedForward (ISTA step); no second residual ----
    xn2 = _layernorm(grad_x, ln2_g_ref[...], ln2_b_ref[...])
    x1 = jnp.dot(xn2, wf_t_ref[...], preferred_element_type=jnp.float32)
    g1 = jnp.dot(x1, wf_ref[...], preferred_element_type=jnp.float32)
    g2 = jnp.dot(xn2, wf_ref[...], preferred_element_type=jnp.float32)
    upd = STEP * (g2 - g1) - STEP * LAMBD
    # TODO(synk): present the output lane-dense as (B, N*D) (256 lanes) once
    # the lane-splitting reshape (rows, D) -> (bt, n_tok*D) is verified to
    # lower in Mosaic; with D=32 these stores use only 32/128 lanes.
    o_ref[...] = jnp.maximum(xn2 + upd, 0.0)


def _pick_batch_tile(batch, target=256):
    """Largest divisor of `batch` <= target; keep >=2 grid steps for v7x."""
    bt = max(d for d in range(1, min(batch, target) + 1) if batch % d == 0)
    if bt == batch and batch > 1 and batch % 2 == 0:
        bt = batch // 2          # two balanced parallel steps (dual-TC v7x)
    return bt


@jax.jit
def crate_block(x, params):
    B, N, D = x.shape
    assert D == DIM
    ln1_g, ln1_b, wqkv, wo, bo, ln2_g, ln2_b, wf = params

    # Pre-arrange weights once, outside the kernel (no in-kernel .T):
    #   wqkv_h[h] = Wqkv[h*dh:(h+1)*dh, :].T  -> (D, dh)
    #   wo_h[h]   = Wo[:, h*dh:(h+1)*dh].T    -> (dh, D)
    wqkv_h = wqkv.reshape(HEADS, DIM_HEAD, DIM).transpose(0, 2, 1)  # (H, D, dh)
    wo_h = wo.reshape(DIM, HEADS, DIM_HEAD).transpose(1, 2, 0)      # (H, dh, D)
    wf_t = wf.T

    bt = _pick_batch_tile(B)
    rows = bt * N
    x2d = x.reshape(B * N, D)        # token-major, free reshape

    full = lambda shape: pl.BlockSpec(shape, lambda i: (0,) * len(shape))
    grid_spec = pltpu.PrefetchScalarGridSpec(
        num_scalar_prefetch=0,
        grid=(B // bt,),
        in_specs=[
            pl.BlockSpec((rows, D), lambda i: (i, 0)),     # x token rows
            full((1, D)), full((1, D)),                    # ln1 gamma/beta
            full((HEADS, DIM, DIM_HEAD)),                  # per-head Wqkv^T
            full((HEADS, DIM_HEAD, DIM)),                  # per-head Wo^T
            full((1, D)),                                  # to_out bias
            full((1, D)), full((1, D)),                    # ln2 gamma/beta
            full((DIM, DIM)), full((DIM, DIM)),            # Wf, Wf^T
        ],
        out_specs=pl.BlockSpec((rows, D), lambda i: (i, 0)),
    )
    out2d = pl.pallas_call(
        functools.partial(crate_block_kernel, N),
        out_shape=jax.ShapeDtypeStruct((B * N, D), jnp.float32),
        grid_spec=grid_spec,
        compiler_params=pltpu.CompilerParams(
            dimension_semantics=("parallel",)),
    )(x2d, ln1_g, ln1_b, wqkv_h, wo_h, bo, ln2_g, ln2_b, wf, wf_t)
    return out2d.reshape(B, N, D)


def init_params(key):
    ks = jax.random.split(key, 8)
    u = lambda k, shape, bound: jax.random.uniform(
        k, shape, jnp.float32, -bound, bound)
    ln1_g = jnp.ones((1, DIM), jnp.float32)
    ln1_b = jnp.zeros((1, DIM), jnp.float32)
    ln2_g = jnp.ones((1, DIM), jnp.float32)
    ln2_b = jnp.zeros((1, DIM), jnp.float32)
    # nn.Linear default init: U(-1/sqrt(fan_in), 1/sqrt(fan_in))
    wqkv = u(ks[0], (INNER, DIM), 1.0 / (DIM ** 0.5))
    wo = u(ks[1], (DIM, INNER), 1.0 / (INNER ** 0.5))
    bo = u(ks[2], (1, DIM), 1.0 / (INNER ** 0.5))
    # kaiming_uniform_ (a=0, fan_in): bound = sqrt(6 / fan_in)
    wf = u(ks[3], (DIM, DIM), (6.0 / DIM) ** 0.5)
    return (ln1_g, ln1_b, wqkv, wo, bo, ln2_g, ln2_b, wf)


def crate_block_ref(x, params):
    """Pure-JAX reference for validation."""
    ln1_g, ln1_b, wqkv, wo, bo, ln2_g, ln2_b, wf = params
    xn = _layernorm(x, ln1_g[0], ln1_b[0])
    w = jnp.einsum('bnd,ed->bne', xn, wqkv)                  # (B, N, INNER)
    B, N, _ = x.shape
    wh = w.reshape(B, N, HEADS, DIM_HEAD).transpose(0, 2, 1, 3)  # (B,H,N,dh)
    dots = jnp.einsum('bhnd,bhmd->bhnm', wh, wh) * SCALE
    attn = jax.nn.softmax(dots, axis=-1)
    out = jnp.einsum('bhnm,bhmd->bhnd', attn, wh)
    out = out.transpose(0, 2, 1, 3).reshape(B, N, INNER)
    attn_out = jnp.einsum('bne,de->bnd', out, wo) + bo[0]
    grad_x = attn_out + x
    xn2 = _layernorm(grad_x, ln2_g[0], ln2_b[0])
    x1 = jnp.einsum('bnd,ed->bne', xn2, wf)
    g1 = jnp.einsum('bne,ed->bnd', x1, wf)
    g2 = jnp.einsum('bnd,de->bne', xn2, wf)
    upd = STEP * (g2 - g1) - STEP * LAMBD
    return jnp.maximum(xn2 + upd, 0.0)


if __name__ == "__main__":
    key = jax.random.PRNGKey(0)
    kx, kp = jax.random.split(key)
    B, N = 2, 8
    x = jax.random.normal(kx, (B, N, DIM), jnp.float32)
    params = init_params(kp)

    out = crate_block(x, params)
    jax.block_until_ready(out)

    ref = crate_block_ref(x, params)
    assert out.shape == (B, N, DIM)
    assert jnp.allclose(out, ref, atol=2e-2, rtol=2e-2), "mismatch vs reference"
    print("KERNEL_OK")
</pallas_src>

<mosaic_0001>
module attributes {stable_mosaic.version = 11 : i64} {
  func.func @crate_block_kernel(%arg0: i32, %arg1: memref<8x32xf32, #tpu.memory_space<vmem>>, %arg2: memref<1x32xf32, #tpu.memory_space<vmem>>, %arg3: memref<1x32xf32, #tpu.memory_space<vmem>>, %arg4: memref<4x32x8xf32, #tpu.memory_space<vmem>>, %arg5: memref<4x8x32xf32, #tpu.memory_space<vmem>>, %arg6: memref<1x32xf32, #tpu.memory_space<vmem>>, %arg7: memref<1x32xf32, #tpu.memory_space<vmem>>, %arg8: memref<1x32xf32, #tpu.memory_space<vmem>>, %arg9: memref<32x32xf32, #tpu.memory_space<vmem>>, %arg10: memref<32x32xf32, #tpu.memory_space<vmem>>, %arg11: memref<8x32xf32, #tpu.memory_space<vmem>>) attributes {dimension_semantics = [#tpu.dimension_semantics<parallel>], iteration_bounds = array<i64: 2>, scalar_prefetch = 0 : i64, scratch_operands = 0 : i64, tpu.core_type = #tpu.core_type<tc>, window_params = [{transform_indices = @transform_0, window_bounds = array<i64: 8, 32>}, {pipeline_mode = #tpu.pipeline_mode<synchronous>, transform_indices = @transform_1, window_bounds = array<i64: 1, 32>}, {pipeline_mode = #tpu.pipeline_mode<synchronous>, transform_indices = @transform_2, window_bounds = array<i64: 1, 32>}, {pipeline_mode = #tpu.pipeline_mode<synchronous>, transform_indices = @transform_3, window_bounds = array<i64: 4, 32, 8>}, {pipeline_mode = #tpu.pipeline_mode<synchronous>, transform_indices = @transform_4, window_bounds = array<i64: 4, 8, 32>}, {pipeline_mode = #tpu.pipeline_mode<synchronous>, transform_indices = @transform_5, window_bounds = array<i64: 1, 32>}, {pipeline_mode = #tpu.pipeline_mode<synchronous>, transform_indices = @transform_6, window_bounds = array<i64: 1, 32>}, {pipeline_mode = #tpu.pipeline_mode<synchronous>, transform_indices = @transform_7, window_bounds = array<i64: 1, 32>}, {pipeline_mode = #tpu.pipeline_mode<synchronous>, transform_indices = @transform_8, window_bounds = array<i64: 32, 32>}, {pipeline_mode = #tpu.pipeline_mode<synchronous>, transform_indices = @transform_9, window_bounds = array<i64: 32, 32>}, {transform_indices = @transform_10, window_bounds = array<i64: 8, 32>}]} {
    %c0 = arith.constant 0 : index
    %c0_0 = arith.constant 0 : index
    %0 = vector.load %arg1[%c0, %c0_0] : memref<8x32xf32, #tpu.memory_space<vmem>>, vector<8x32xf32>
    %c0_1 = arith.constant 0 : index
    %c0_2 = arith.constant 0 : index
    %1 = vector.load %arg2[%c0_1, %c0_2] : memref<1x32xf32, #tpu.memory_space<vmem>>, vector<1x32xf32>
    %c0_3 = arith.constant 0 : index
    %c0_4 = arith.constant 0 : index
    %2 = vector.load %arg3[%c0_3, %c0_4] : memref<1x32xf32, #tpu.memory_space<vmem>>, vector<1x32xf32>
    %cst = arith.constant dense<0.000000e+00> : vector<8xf32>
    %3 = vector.multi_reduction <add>, %0, %cst [1] : vector<8x32xf32> to vector<8xf32>
    %4 = vector.shape_cast %3 : vector<8xf32> to vector<8x1xf32>
    %cst_5 = arith.constant 3.200000e+01 : f32
    %5 = vector.broadcast %cst_5 : f32 to vector<8x1xf32>
    %6 = arith.divf %4, %5 : vector<8x1xf32>
    %7 = vector.broadcast %6 : vector<8x1xf32> to vector<8x32xf32>
    %8 = arith.subf %0, %7 : vector<8x32xf32>
    %9 = arith.mulf %8, %8 : vector<8x32xf32>
    %cst_6 = arith.constant dense<0.000000e+00> : vector<8xf32>
    %10 = vector.multi_reduction <add>, %9, %cst_6 [1] : vector<8x32xf32> to vector<8xf32>
    %11 = vector.shape_cast %10 : vector<8xf32> to vector<8x1xf32>
    %cst_7 = arith.constant 3.200000e+01 : f32
    %12 = vector.broadcast %cst_7 : f32 to vector<8x1xf32>
    %13 = arith.divf %11, %12 : vector<8x1xf32>
    %14 = vector.broadcast %6 : vector<8x1xf32> to vector<8x32xf32>
    %15 = arith.subf %0, %14 : vector<8x32xf32>
    %cst_8 = arith.constant 9.99999974E-6 : f32
    %16 = vector.broadcast %cst_8 : f32 to vector<8x1xf32>
    %17 = arith.addf %13, %16 : vector<8x1xf32>
    %18 = math.rsqrt %17 : vector<8x1xf32>
    %19 = vector.broadcast %18 : vector<8x1xf32> to vector<8x32xf32>
    %20 = arith.mulf %15, %19 : vector<8x32xf32>
    %21 = vector.broadcast %1 : vector<1x32xf32> to vector<8x32xf32>
    %22 = arith.mulf %20, %21 : vector<8x32xf32>
    %23 = vector.broadcast %2 : vector<1x32xf32> to vector<8x32xf32>
    %24 = arith.addf %22, %23 : vector<8x32xf32>
    %c0_9 = arith.constant 0 : index
    %c0_10 = arith.constant 0 : index
    %25 = vector.load %arg6[%c0_9, %c0_10] : memref<1x32xf32, #tpu.memory_space<vmem>>, vector<1x32xf32>
    %26 = vector.broadcast %25 : vector<1x32xf32> to vector<8x32xf32>
    %27 = arith.addf %0, %26 : vector<8x32xf32>
    %c0_11 = arith.constant 0 : index
    %c0_12 = arith.constant 0 : index
    %c0_13 = arith.constant 0 : index
    %28 = vector.load %arg4[%c0_11, %c0_12, %c0_13] : memref<4x32x8xf32, #tpu.memory_space<vmem>>, vector<1x32x8xf32>
    %29 = vector.shape_cast %28 : vector<1x32x8xf32> to vector<32x8xf32>
    %cst_14 = arith.constant dense<0.000000e+00> : vector<8x8xf32>
    %30 = tpu.matmul %24, %29, %cst_14 {dimension_numbers = #tpu.dot_dimension_numbers<[1], [0], [0], [1], [0, 0, 1, 1], [], []>} : vector<8x32xf32>, vector<32x8xf32>, vector<8x8xf32> -> vector<8x8xf32>
    %31 = vector.shape_cast %30 : vector<8x8xf32> to vector<1x8x8xf32>
    "tpu.trace_start"() <{level = 10 : i32, message = "bnd,bmd->bnm"}> : () -> ()
    %cst_15 = arith.constant dense<0.000000e+00> : vector<1x8x8xf32>
    %32 = tpu.matmul %31, %31, %cst_15 {dimension_numbers = #tpu.dot_dimension_numbers<[2], [2], [1], [1], [0, 0, 0, 1, 1, 1], [0], [0]>} : vector<1x8x8xf32>, vector<1x8x8xf32>, vector<1x8x8xf32> -> vector<1x8x8xf32>
    "tpu.trace_stop"() : () -> ()
    %cst_16 = arith.constant 0.353553385 : f32
    %33 = vector.broadcast %cst_16 : f32 to vector<1x8x8xf32>
    %34 = arith.mulf %32, %33 : vector<1x8x8xf32>
    %cst_17 = arith.constant dense<0xFF800000> : vector<1x8xf32>
    %35 = vector.multi_reduction <maximumf>, %34, %cst_17 [2] : vector<1x8x8xf32> to vector<1x8xf32>
    %36 = vector.shape_cast %35 : vector<1x8xf32> to vector<1x8x1xf32>
    %37 = vector.broadcast %36 : vector<1x8x1xf32> to vector<1x8x8xf32>
    %38 = arith.subf %34, %37 : vector<1x8x8xf32>
    %39 = math.exp %38 : vector<1x8x8xf32>
    %cst_18 = arith.constant dense<0.000000e+00> : vector<1x8xf32>
    %40 = vector.multi_reduction <add>, %39, %cst_18 [2] : vector<1x8x8xf32> to vector<1x8xf32>
    %41 = vector.shape_cast %40 : vector<1x8xf32> to vector<1x8x1xf32>
    %42 = vector.broadcast %41 : vector<1x8x1xf32> to vector<1x8x8xf32>
    %43 = arith.divf %39, %42 : vector<1x8x8xf32>
    "tpu.trace_start"() <{level = 10 : i32, message = "bnm,bmd->bnd"}> : () -> ()
    %cst_19 = arith.constant dense<0.000000e+00> : vector<1x8x8xf32>
    %44 = tpu.matmul %43, %31, %cst_19 {dimension_numbers = #tpu.dot_dimension_numbers<[2], [1], [1], [2], [0, 0, 0, 1, 1, 2], [0], [0]>} : vector<1x8x8xf32>, vector<1x8x8xf32>, vector<1x8x8xf32> -> vector<1x8x8xf32>
    "tpu.trace_stop"() : () -> ()
    %45 = vector.shape_cast %44 : vector<1x8x8xf32> to vector<8x8xf32>
    %c0_20 = arith.constant 0 : index
    %c0_21 = arith.constant 0 : index
    %c0_22 = arith.constant 0 : index
    %46 = vector.load %arg5[%c0_20, %c0_21, %c0_22] : memref<4x8x32xf32, #tpu.memory_space<vmem>>, vector<1x8x32xf32>
    %47 = vector.shape_cast %46 : vector<1x8x32xf32> to vector<8x32xf32>
    %cst_23 = arith.constant dense<0.000000e+00> : vector<8x32xf32>
    %48 = tpu.matmul %45, %47, %cst_23 {dimension_numbers = #tpu.dot_dimension_numbers<[1], [0], [0], [1], [0, 0, 1, 1], [], []>} : vector<8x8xf32>, vector<8x32xf32>, vector<8x32xf32> -> vector<8x32xf32>
    %49 = arith.addf %27, %48 : vector<8x32xf32>
    %c1 = arith.constant 1 : index
    %c0_24 = arith.constant 0 : index
    %c0_25 = arith.constant 0 : index
    %50 = vector.load %arg4[%c1, %c0_24, %c0_25] : memref<4x32x8xf32, #tpu.memory_space<vmem>>, vector<1x32x8xf32>
    %51 = vector.shape_cast %50 : vector<1x32x8xf32> to vector<32x8xf32>
    %cst_26 = arith.constant dense<0.000000e+00> : vector<8x8xf32>
    %52 = tpu.matmul %24, %51, %cst_26 {dimension_numbers = #tpu.dot_dimension_numbers<[1], [0], [0], [1], [0, 0, 1, 1], [], []>} : vector<8x32xf32>, vector<32x8xf32>, vector<8x8xf32> -> vector<8x8xf32>
    %53 = vector.shape_cast %52 : vector<8x8xf32> to vector<1x8x8xf32>
    "tpu.trace_start"() <{level = 10 : i32, message = "bnd,bmd->bnm"}> : () -> ()
    %cst_27 = arith.constant dense<0.000000e+00> : vector<1x8x8xf32>
    %54 = tpu.matmul %53, %53, %cst_27 {dimension_numbers = #tpu.dot_dimension_numbers<[2], [2], [1], [1], [0, 0, 0, 1, 1, 1], [0], [0]>} : vector<1x8x8xf32>, vector<1x8x8xf32>, vector<1x8x8xf32> -> vector<1x8x8xf32>
    "tpu.trace_stop"() : () -> ()
    %cst_28 = arith.constant 0.353553385 : f32
    %55 = vector.broadcast %cst_28 : f32 to vector<1x8x8xf32>
    %56 = arith.mulf %54, %55 : vector<1x8x8xf32>
    %cst_29 = arith.constant dense<0xFF800000> : vector<1x8xf32>
    %57 = vector.multi_reduction <maximumf>, %56, %cst_29 [2] : vector<1x8x8xf32> to vector<1x8xf32>
    %58 = vector.shape_cast %57 : vector<1x8xf32> to vector<1x8x1xf32>
    %59 = vector.broadcast %58 : vector<1x8x1xf32> to vector<1x8x8xf32>
    %60 = arith.subf %56, %59 : vector<1x8x8xf32>
    %61 = math.exp %60 : vector<1x8x8xf32>
    %cst_30 = arith.constant dense<0.000000e+00> : vector<1x8xf32>
    %62 = vector.multi_reduction <add>, %61, %cst_30 [2] : vector<1x8x8xf32> to vector<1x8xf32>
    %63 = vector.shape_cast %62 : vector<1x8xf32> to vector<1x8x1xf32>
    %64 = vector.broadcast %63 : vector<1x8x1xf32> to vector<1x8x8xf32>
    %65 = arith.divf %61, %64 : vector<1x8x8xf32>
    "tpu.trace_start"() <{level = 10 : i32, message = "bnm,bmd->bnd"}> : () -> ()
    %cst_31 = arith.constant dense<0.000000e+00> : vector<1x8x8xf32>
    %66 = tpu.matmul %65, %53, %cst_31 {dimension_numbers = #tpu.dot_dimension_numbers<[2], [1], [1], [2], [0, 0, 0, 1, 1, 2], [0], [0]>} : vector<1x8x8xf32>, vector<1x8x8xf32>, vector<1x8x8xf32> -> vector<1x8x8xf32>
    "tpu.trace_stop"() : () -> ()
    %67 = vector.shape_cast %66 : vector<1x8x8xf32> to vector<8x8xf32>
    %c1_32 = arith.constant 1 : index
    %c0_33 = arith.constant 0 : index
    %c0_34 = arith.constant 0 : index
    %68 = vector.load %arg5[%c1_32, %c0_33, %c0_34] : memref<4x8x32xf32, #tpu.memory_space<vmem>>, vector<1x8x32xf32>
    %69 = vector.shape_cast %68 : vector<1x8x32xf32> to vector<8x32xf32>
    %cst_35 = arith.constant dense<0.000000e+00> : vector<8x32xf32>
    %70 = tpu.matmul %67, %69, %cst_35 {dimension_numbers = #tpu.dot_dimension_numbers<[1], [0], [0], [1], [0, 0, 1, 1], [], []>} : vector<8x8xf32>, vector<8x32xf32>, vector<8x32xf32> -> vector<8x32xf32>
    %71 = arith.addf %49, %70 : vector<8x32xf32>
    %c2 = arith.constant 2 : index
    %c0_36 = arith.constant 0 : index
    %c0_37 = arith.constant 0 : index
    %72 = vector.load %arg4[%c2, %c0_36, %c0_37] : memref<4x32x8xf32, #tpu.memory_space<vmem>>, vector<1x32x8xf32>
    %73 = vector.shape_cast %72 : vector<1x32x8xf32> to vector<32x8xf32>
    %cst_38 = arith.constant dense<0.000000e+00> : vector<8x8xf32>
    %74 = tpu.matmul %24, %73, %cst_38 {dimension_numbers = #tpu.dot_dimension_numbers<[1], [0], [0], [1], [0, 0, 1, 1], [], []>} : vector<8x32xf32>, vector<32x8xf32>, vector<8x8xf32> -> vector<8x8xf32>
    %75 = vector.shape_cast %74 : vector<8x8xf32> to vector<1x8x8xf32>
    "tpu.trace_start"() <{level = 10 : i32, message = "bnd,bmd->bnm"}> : () -> ()
    %cst_39 = arith.constant dense<0.000000e+00> : vector<1x8x8xf32>
    %76 = tpu.matmul %75, %75, %cst_39 {dimension_numbers = #tpu.dot_dimension_numbers<[2], [2], [1], [1], [0, 0, 0, 1, 1, 1], [0], [0]>} : vector<1x8x8xf32>, vector<1x8x8xf32>, vector<1x8x8xf32> -> vector<1x8x8xf32>
    "tpu.trace_stop"() : () -> ()
    %cst_40 = arith.constant 0.353553385 : f32
    %77 = vector.broadcast %cst_40 : f32 to vector<1x8x8xf32>
    %78 = arith.mulf %76, %77 : vector<1x8x8xf32>
    %cst_41 = arith.constant dense<0xFF800000> : vector<1x8xf32>
    %79 = vector.multi_reduction <maximumf>, %78, %cst_41 [2] : vector<1x8x8xf32> to vector<1x8xf32>
    %80 = vector.shape_cast %79 : vector<1x8xf32> to vector<1x8x1xf32>
    %81 = vector.broadcast %80 : vector<1x8x1xf32> to vector<1x8x8xf32>
    %82 = arith.subf %78, %81 : vector<1x8x8xf32>
    %83 = math.exp %82 : vector<1x8x8xf32>
    %cst_42 = arith.constant dense<0.000000e+00> : vector<1x8xf32>
    %84 = vector.multi_reduction <add>, %83, %cst_42 [2] : vector<1x8x8xf32> to vector<1x8xf32>
    %85 = vector.shape_cast %84 : vector<1x8xf32> to vector<1x8x1xf32>
    %86 = vector.broadcast %85 : vector<1x8x1xf32> to vector<1x8x8xf32>
    %87 = arith.divf %83, %86 : vector<1x8x8xf32>
    "tpu.trace_start"() <{level = 10 : i32, message = "bnm,bmd->bnd"}> : () -> ()
    %cst_43 = arith.constant dense<0.000000e+00> : vector<1x8x8xf32>
    %88 = tpu.matmul %87, %75, %cst_43 {dimension_numbers = #tpu.dot_dimension_numbers<[2], [1], [1], [2], [0, 0, 0, 1, 1, 2], [0], [0]>} : vector<1x8x8xf32>, vector<1x8x8xf32>, vector<1x8x8xf32> -> vector<1x8x8xf32>
    "tpu.trace_stop"() : () -> ()
    %89 = vector.shape_cast %88 : vector<1x8x8xf32> to vector<8x8xf32>
    %c2_44 = arith.constant 2 : index
    %c0_45 = arith.constant 0 : index
    %c0_46 = arith.constant 0 : index
    %90 = vector.load %arg5[%c2_44, %c0_45, %c0_46] : memref<4x8x32xf32, #tpu.memory_space<vmem>>, vector<1x8x32xf32>
    %91 = vector.shape_cast %90 : vector<1x8x32xf32> to vector<8x32xf32>
    %cst_47 = arith.constant dense<0.000000e+00> : vector<8x32xf32>
    %92 = tpu.matmul %89, %91, %cst_47 {dimension_numbers = #tpu.dot_dimension_numbers<[1], [0], [0], [1], [0, 0, 1, 1], [], []>} : vector<8x8xf32>, vector<8x32xf32>, vector<8x32xf32> -> vector<8x32xf32>
    %93 = arith.addf %71, %92 : vector<8x32xf32>
    %c3 = arith.constant 3 : index
    %c0_48 = arith.constant 0 : index
    %c0_49 = arith.constant 0 : index
    %94 = vector.load %arg4[%c3, %c0_48, %c0_49] : memref<4x32x8xf32, #tpu.memory_space<vmem>>, vector<1x32x8xf32>
    %95 = vector.shape_cast %94 : vector<1x32x8xf32> to vector<32x8xf32>
    %cst_50 = arith.constant dense<0.000000e+00> : vector<8x8xf32>
    %96 = tpu.matmul %24, %95, %cst_50 {dimension_numbers = #tpu.dot_dimension_numbers<[1], [0], [0], [1], [0, 0, 1, 1], [], []>} : vector<8x32xf32>, vector<32x8xf32>, vector<8x8xf32> -> vector<8x8xf32>
    %97 = vector.shape_cast %96 : vector<8x8xf32> to vector<1x8x8xf32>
    "tpu.trace_start"() <{level = 10 : i32, message = "bnd,bmd->bnm"}> : () -> ()
    %cst_51 = arith.constant dense<0.000000e+00> : vector<1x8x8xf32>
    %98 = tpu.matmul %97, %97, %cst_51 {dimension_numbers = #tpu.dot_dimension_numbers<[2], [2], [1], [1], [0, 0, 0, 1, 1, 1], [0], [0]>} : vector<1x8x8xf32>, vector<1x8x8xf32>, vector<1x8x8xf32> -> vector<1x8x8xf32>
    "tpu.trace_stop"() : () -> ()
    %cst_52 = arith.constant 0.353553385 : f32
    %99 = vector.broadcast %cst_52 : f32 to vector<1x8x8xf32>
    %100 = arith.mulf %98, %99 : vector<1x8x8xf32>
    %cst_53 = arith.constant dense<0xFF800000> : vector<1x8xf32>
    %101 = vector.multi_reduction <maximumf>, %100, %cst_53 [2] : vector<1x8x8xf32> to vector<1x8xf32>
    %102 = vector.shape_cast %101 : vector<1x8xf32> to vector<1x8x1xf32>
    %103 = vector.broadcast %102 : vector<1x8x1xf32> to vector<1x8x8xf32>
    %104 = arith.subf %100, %103 : vector<1x8x8xf32>
    %105 = math.exp %104 : vector<1x8x8xf32>
    %cst_54 = arith.constant dense<0.000000e+00> : vector<1x8xf32>
    %106 = vector.multi_reduction <add>, %105, %cst_54 [2] : vector<1x8x8xf32> to vector<1x8xf32>
    %107 = vector.shape_cast %106 : vector<1x8xf32> to vector<1x8x1xf32>
    %108 = vector.broadcast %107 : vector<1x8x1xf32> to vector<1x8x8xf32>
    %109 = arith.divf %105, %108 : vector<1x8x8xf32>
    "tpu.trace_start"() <{level = 10 : i32, message = "bnm,bmd->bnd"}> : () -> ()
    %cst_55 = arith.constant dense<0.000000e+00> : vector<1x8x8xf32>
    %110 = tpu.matmul %109, %97, %cst_55 {dimension_numbers = #tpu.dot_dimension_numbers<[2], [1], [1], [2], [0, 0, 0, 1, 1, 2], [0], [0]>} : vector<1x8x8xf32>, vector<1x8x8xf32>, vector<1x8x8xf32> -> vector<1x8x8xf32>
    "tpu.trace_stop"() : () -> ()
    %111 = vector.shape_cast %110 : vector<1x8x8xf32> to vector<8x8xf32>
    %c3_56 = arith.constant 3 : index
    %c0_57 = arith.constant 0 : index
    %c0_58 = arith.constant 0 : index
    %112 = vector.load %arg5[%c3_56, %c0_57, %c0_58] : memref<4x8x32xf32, #tpu.memory_space<vmem>>, vector<1x8x32xf32>
    %113 = vector.shape_cast %112 : vector<1x8x32xf32> to vector<8x32xf32>
    %cst_59 = arith.constant dense<0.000000e+00> : vector<8x32xf32>
    %114 = tpu.matmul %111, %113, %cst_59 {dimension_numbers = #tpu.dot_dimension_numbers<[1], [0], [0], [1], [0, 0, 1, 1], [], []>} : vector<8x8xf32>, vector<8x32xf32>, vector<8x32xf32> -> vector<8x32xf32>
    %115 = arith.addf %93, %114 : vector<8x32xf32>
    %c0_60 = arith.constant 0 : index
    %c0_61 = arith.constant 0 : index
    %116 = vector.load %arg7[%c0_60, %c0_61] : memref<1x32xf32, #tpu.memory_space<vmem>>, vector<1x32xf32>
    %c0_62 = arith.constant 0 : index
    %c0_63 = arith.constant 0 : index
    %117 = vector.load %arg8[%c0_62, %c0_63] : memref<1x32xf32, #tpu.memory_space<vmem>>, vector<1x32xf32>
    %cst_64 = arith.constant dense<0.000000e+00> : vector<8xf32>
    %118 = vector.multi_reduction <add>, %115, %cst_64 [1] : vector<8x32xf32> to vector<8xf32>
    %119 = vector.shape_cast %118 : vector<8xf32> to vector<8x1xf32>
    %cst_65 = arith.constant 3.200000e+01 : f32
    %120 = vector.broadcast %cst_65 : f32 to vector<8x1xf32>
    %121 = arith.divf %119, %120 : vector<8x1xf32>
    %122 = vector.broadcast %121 : vector<8x1xf32> to vector<8x32xf32>
    %123 = arith.subf %115, %122 : vector<8x32xf32>
    %124 = arith.mulf %123, %123 : vector<8x32xf32>
    %cst_66 = arith.constant dense<0.000000e+00> : vector<8xf32>
    %125 = vector.multi_reduction <add>, %124, %cst_66 [1] : vector<8x32xf32> to vector<8xf32>
    %126 = vector.shape_cast %125 : vector<8xf32> to vector<8x1xf32>
    %cst_67 = arith.constant 3.200000e+01 : f32
    %127 = vector.broadcast %cst_67 : f32 to vector<8x1xf32>
    %128 = arith.divf %126, %127 : vector<8x1xf32>
    %129 = vector.broadcast %121 : vector<8x1xf32> to vector<8x32xf32>
    %130 = arith.subf %115, %129 : vector<8x32xf32>
    %cst_68 = arith.constant 9.99999974E-6 : f32
    %131 = vector.broadcast %cst_68 : f32 to vector<8x1xf32>
    %132 = arith.addf %128, %131 : vector<8x1xf32>
    %133 = math.rsqrt %132 : vector<8x1xf32>
    %134 = vector.broadcast %133 : vector<8x1xf32> to vector<8x32xf32>
    %135 = arith.mulf %130, %134 : vector<8x32xf32>
    %136 = vector.broadcast %116 : vector<1x32xf32> to vector<8x32xf32>
    %137 = arith.mulf %135, %136 : vector<8x32xf32>
    %138 = vector.broadcast %117 : vector<1x32xf32> to vector<8x32xf32>
    %139 = arith.addf %137, %138 : vector<8x32xf32>
    %c0_69 = arith.constant 0 : index
    %c0_70 = arith.constant 0 : index
    %140 = vector.load %arg10[%c0_69, %c0_70] : memref<32x32xf32, #tpu.memory_space<vmem>>, vector<32x32xf32>
    %cst_71 = arith.constant dense<0.000000e+00> : vector<8x32xf32>
    %141 = tpu.matmul %139, %140, %cst_71 {dimension_numbers = #tpu.dot_dimension_numbers<[1], [0], [0], [1], [0, 0, 1, 1], [], []>} : vector<8x32xf32>, vector<32x32xf32>, vector<8x32xf32> -> vector<8x32xf32>
    %c0_72 = arith.constant 0 : index
    %c0_73 = arith.constant 0 : index
    %142 = vector.load %arg9[%c0_72, %c0_73] : memref<32x32xf32, #tpu.memory_space<vmem>>, vector<32x32xf32>
    %cst_74 = arith.constant dense<0.000000e+00> : vector<8x32xf32>
    %143 = tpu.matmul %141, %142, %cst_74 {dimension_numbers = #tpu.dot_dimension_numbers<[1], [0], [0], [1], [0, 0, 1, 1], [], []>} : vector<8x32xf32>, vector<32x32xf32>, vector<8x32xf32> -> vector<8x32xf32>
    %c0_75 = arith.constant 0 : index
    %c0_76 = arith.constant 0 : index
    %144 = vector.load %arg9[%c0_75, %c0_76] : memref<32x32xf32, #tpu.memory_space<vmem>>, vector<32x32xf32>
    %cst_77 = arith.constant dense<0.000000e+00> : vector<8x32xf32>
    %145 = tpu.matmul %139, %144, %cst_77 {dimension_numbers = #tpu.dot_dimension_numbers<[1], [0], [0], [1], [0, 0, 1, 1], [], []>} : vector<8x32xf32>, vector<32x32xf32>, vector<8x32xf32> -> vector<8x32xf32>
    %146 = arith.subf %145, %143 : vector<8x32xf32>
    %cst_78 = arith.constant 1.000000e-01 : f32
    %147 = vector.broadcast %cst_78 : f32 to vector<8x32xf32>
    %148 = arith.mulf %147, %146 : vector<8x32xf32>
    %cst_79 = arith.constant 5.000000e-01 : f32
    %149 = vector.broadcast %cst_79 : f32 to vector<8x32xf32>
    %150 = arith.subf %148, %149 : vector<8x32xf32>
    %151 = arith.addf %139, %150 : vector<8x32xf32>
    %cst_80 = arith.constant 0.000000e+00 : f32
    %152 = vector.broadcast %cst_80 : f32 to vector<8x32xf32>
    %153 = arith.maximumf %151, %152 : vector<8x32xf32>
    %c0_81 = arith.constant 0 : index
    %c0_82 = arith.constant 0 : index
    %154 = vector.load %arg11[%c0_81, %c0_82] : memref<8x32xf32, #tpu.memory_space<vmem>>, vector<8x32xf32>
    tpu.vector_store %arg11[%c0_81, %c0_82], %153 {strides = array<i32>} : memref<8x32xf32, #tpu.memory_space<vmem>>, vector<8x32xf32>,
    return
  }
  func.func @transform_0(%arg0: i32) -> (i32, i32) {
    %c0_i32 = arith.constant 0 : i32
    %c0_i32_0 = arith.constant 0 : i32
    return %arg0, %c0_i32 : i32, i32
  }
  func.func @transform_1(%arg0: i32) -> (i32, i32) {
    %c0_i32 = arith.constant 0 : i32
    %c0_i32_0 = arith.constant 0 : i32
    %c0_i32_1 = arith.constant 0 : i32
    return %c0_i32, %c0_i32_0 : i32, i32
  }
  func.func @transform_2(%arg0: i32) -> (i32, i32) {
    %c0_i32 = arith.constant 0 : i32
    %c0_i32_0 = arith.constant 0 : i32
    %c0_i32_1 = arith.constant 0 : i32
    return %c0_i32, %c0_i32_0 : i32, i32
  }
  func.func @transform_3(%arg0: i32) -> (i32, i32, i32) {
    %c0_i32 = arith.constant 0 : i32
    %c0_i32_0 = arith.constant 0 : i32
    %c0_i32_1 = arith.constant 0 : i32
    %c0_i32_2 = arith.constant 0 : i32
    return %c0_i32, %c0_i32_0, %c0_i32_1 : i32, i32, i32
  }
  func.func @transform_4(%arg0: i32) -> (i32, i32, i32) {
    %c0_i32 = arith.constant 0 : i32
    %c0_i32_0 = arith.constant 0 : i32
    %c0_i32_1 = arith.constant 0 : i32
    %c0_i32_2 = arith.constant 0 : i32
    return %c0_i32, %c0_i32_0, %c0_i32_1 : i32, i32, i32
  }
  func.func @transform_5(%arg0: i32) -> (i32, i32) {
    %c0_i32 = arith.constant 0 : i32
    %c0_i32_0 = arith.constant 0 : i32
    %c0_i32_1 = arith.constant 0 : i32
    return %c0_i32, %c0_i32_0 : i32, i32
  }
  func.func @transform_6(%arg0: i32) -> (i32, i32) {
    %c0_i32 = arith.constant 0 : i32
    %c0_i32_0 = arith.constant 0 : i32
    %c0_i32_1 = arith.constant 0 : i32
    return %c0_i32, %c0_i32_0 : i32, i32
  }
  func.func @transform_7(%arg0: i32) -> (i32, i32) {
    %c0_i32 = arith.constant 0 : i32
    %c0_i32_0 = arith.constant 0 : i32
    %c0_i32_1 = arith.constant 0 : i32
    return %c0_i32, %c0_i32_0 : i32, i32
  }
  func.func @transform_8(%arg0: i32) -> (i32, i32) {
    %c0_i32 = arith.constant 0 : i32
    %c0_i32_0 = arith.constant 0 : i32
    %c0_i32_1 = arith.constant 0 : i32
    return %c0_i32, %c0_i32_0 : i32, i32
  }
  func.func @transform_9(%arg0: i32) -> (i32, i32) {
    %c0_i32 = arith.constant 0 : i32
    %c0_i32_0 = arith.constant 0 : i32
    %c0_i32_1 = arith.constant 0 : i32
    return %c0_i32, %c0_i32_0 : i32, i32
  }
  func.func @transform_10(%arg0: i32) -> (i32, i32) {
    %c0_i32 = arith.constant 0 : i32
    %c0_i32_0 = arith.constant 0 : i32
    return %arg0, %c0_i32 : i32, i32
  }
}

</mosaic_0001>

<bundles_post_ra>
// kernel: crate_block.1
= control target key start
LH: loop header
LB: loop body
LE: loop exit
PB: predicated region body
PF: predicated region fallthrough
CT: control target
= control target key end

     0   :  { %s2707_s0 = inlined_call_operand.vmem [shape: f32[16,32], index: 0, kind: input, shape index: {}]   ;;  %s2708_s1 = inlined_call_operand.vmem [shape: f32[1,32], index: 1, kind: input, shape index: {}]   ;;  %s2709_s2 = inlined_call_operand.vmem [shape: f32[1,32], index: 2, kind: input, shape index: {}]   ;;  %s2710_s3 = inlined_call_operand.vmem [shape: f32[4,32,8], index: 3, kind: input, shape index: {}]   ;;  %s2711_s4 = inlined_call_operand.vmem [shape: f32[4,8,32], index: 4, kind: input, shape index: {}]   ;;  %s2712_s5 = inlined_call_operand.vmem [shape: f32[1,32], index: 5, kind: input, shape index: {}]   ;;  %s2713_s6 = inlined_call_operand.vmem [shape: f32[1,32], index: 6, kind: input, shape index: {}]   ;;  %s2714_s7 = inlined_call_operand.vmem [shape: f32[1,32], index: 7, kind: input, shape index: {}]   ;;  %s2715_s8 = inlined_call_operand.vmem [shape: f32[32,32], index: 8, kind: input, shape index: {}]   ;;  %s2716_s9 = inlined_call_operand.vmem [shape: f32[32,32], index: 9, kind: input, shape index: {}]   ;;  %s2717_s10 = inlined_call_operand.hbm [shape: f32[16,32], index: 10, kind: output, shape index: {}]  }
   0x1   :  { %2718 = sst [smem:[#allocation5_spill]] %s2707_s0 }
   0x2   :  { %15 = vsyncpa [#allocation3], 0 }
   0x3   :  { %17 = vsyncpa [#allocation3 + $0x1], 0  ;;  %s2396_s13 = smov 0   ;;  %s2398_s14 = smov 0  }
   0x4   :  { %s2400_s15 = smov 0   ;;  %s2402_s16 = smov 0  }
   0x5 LB: > { %s2417_s17 = sadd.s32 4294967295, %s2336_s16   ;;  %s1965_s18 = sadd.s32 4294967294, %s2336_s16   ;;  %s2336_s16 = sphi %s2402_s16, %s2725_s16   ;;  %s2332_s15 = sphi %s2400_s15, %s2724_s15   ;;  %s2328_s14 = sphi %s2398_s14, %s2723_s14   ;;  %s2324_s13 = sphi %s2396_s13, %s2722_s13  }
   0x6   : > { %s2421_s19 = sadd.s32 1, %s2336_s16   ;;  %s245_s20 = sadd.s32 1, %s2332_s15 }
   0x7   : > { %s242_s21 = ssub.s32 %s2336_s16, %s2421_s19  ;;  %p255_p0 = scmp.ne.s32.totalorder %s2332_s15, %s2328_s14 }
   0x8   : > { %p243_p1 = scmp.eq.s32.totalorder %s242_s21, 0  ;;  %p256_p2 = scmp.eq.s32.totalorder %s2417_s17, 1 }
   0x9   : > { %p261_p3 = scmp.ne.s32.totalorder %s2328_s14, %s2324_s13  ;;  %p262_p4 = scmp.eq.s32.totalorder %s1965_s18, 1 }
   0xa   : > { %s2432_s22 = scalar_select %p243_p1, %s2332_s15, %s245_s20  }
   0xb   : > { %p2434_p5 = por %p256_p2, %p255_p0  ;;  %p2438_p6 = por %p262_p4, %p261_p3 }
   0xc   : > { %p1968_p7 = scmp.ge.s32.totalorder %s2336_s16, 1  ;;  %p314_p8 = scmp.lt.s32.totalorder %s2336_s16, 3 }
   0xe   : > { %p315_p9 = pnand %p1968_p7, %p314_p8 }
   0xf   : > { %p351_p10 = scmp.lt.s32.totalorder (!%p315_p9), %s2417_s17, 1  ;;  %s2721_s0 = sld [smem:[#allocation5_spill]] (!%p315_p9) }
  0x10   : > { %318 = sbr.rel (%p315_p9) target bundleno = 4468 (0x1174), region = 60  ;;  %s348_s30 = sand.u32 (!%p315_p9), 1, %s2328_s14  }
  0x11   : > { %s1969_s11 = sshll.u32 (!%p315_p9), %s348_s30, 3  ;;  %s2016_s12 = sshll.u32 (!%p315_p9), %s2417_s17, 7 }
  0x12   : > { %s350_s18 = scalar_lea.vmem (!%p315_p9), [#allocation2], %s1969_s11  ;;  %s1893_s27 = scalar_lea.sflag (!%p315_p9), [#allocation3], %s348_s30 }
  0x13   : > { %s1906_s20 = sshll.u32 (!%p315_p9), %s350_s18, 4  ;;  %s1907_s20 = int_to_ptr.vmem [resolvable:$true] %s1906_s20 }
  0x14   : > { %s2276_s28 = scalar_lea.vmem (!%p315_p9), %s1907_s20, 128 }
  0x15   : > { %s352_s25 = scalar_select %p351_p10, %s2417_s17, 1  ;;  %vm358_vm0 = vcmask 261120   ;;  %v398_v7 = vld [vmem:[%s2710_s3 + $0x18] sm:$0xff]  ;;  %v2338_v8 = vmov 0.0   ;;  %v397_v9 = vld [vmem:[%s2710_s3 + $0x10] sm:$0xff]  ;;  %vm2339_vm1 = vmmov 0  }
  0x16   : > { %2078 = vmatprep.subr.mxu0 %v2338_v8  ;;  %2086 = vmatprep.mubr.msk.f32.mxu0 %vm2339_vm1, %v2338_v8  ;;  %v396_v10 = vld [vmem:[%s2710_s3 + $0x8] sm:$0xff]  ;;  %v395_v11 = vld [vmem:[%s2710_s3] sm:$0xff]  ;;  %vm472_vm2 = vcmask 64512   ;;  %v1982_v36 = vld [vmem:[%s2710_s3 + $0x38] sm:$0xff]  ;;  %p2277_p11 = scmp.ne.s32.totalorder %s1907_s20, %s2276_s28 }
  0x17   : > { %s1970_s26 = sshll.u32 %s352_s25, 3  ;;  %2079 = vmatpush3.msra.mxu0 %v398_v7  ;;  %2089 = vmatprep.subr.mxu1 %v2338_v8  ;;  %v1971_v16 = vld [vmem:[%s2708_s1] ss:$0 sm:$0xff]  ;;  %v1981_v38 = vld [vmem:[%s2710_s3 + $0x30] sm:$0xff]  ;;  %v1980_v40 = vld [vmem:[%s2710_s3 + $0x28] sm:$0xff] }
  0x18   : > { %s354_s29 = scalar_lea.vmem %s2721_s0, %s1970_s26  ;;  %2080 = vmatprep.subr.mxu0 %v2338_v8  ;;  %2091 = vmatprep.mubr.msk.f32.mxu1 %vm2339_vm1, %v2338_v8  ;;  %v1972_v18 = vld [vmem:[%s2709_s2] ss:$0 sm:$0xff]  ;;  %v1992_v58 = vld [vmem:[%s2710_s3 + $0x58] sm:$0xff]  ;;  %v1991_v59 = vld [vmem:[%s2710_s3 + $0x50] sm:$0xff]  ;;  %s1904_s26 = scalar_lea.hbm %s2717_s10, %s2016_s12 }
  0x19   : > { %v2449_v0 = vld [vmem:[%s354_s29] sm:$0xff]  ;;  %2081 = vmatpush3.msra.mxu0 %v397_v9  ;;  %v1990_v60 = vld [vmem:[%s2710_s3 + $0x48] sm:$0xff]  ;;  %p2278_p12 = pnand %p2277_p11, %p2434_p5  ;;  %s2340_s29 = smov [#allocation2]  }
  0x1a   : > { %v359_v1 = vsel %vm358_vm0, %v2449_v0, 0.0  ;;  %2082 = vmatprep.subr.mxu0 %v2338_v8  ;;  %v631_v35 = vld [vmem:[%s2711_s4] sm:$0xff]  ;;  %v1987_v62 = vld [vmem:[%s2711_s4 + $0x8] sm:$0xff]  ;;  %s2280_s0 = sshll.u32 %s2340_s29, 4  ;;  %s2281_s0 = int_to_ptr.vmem [resolvable:$false] %s2280_s0 }
  0x1b   : > { %360 = vadd.xlane.f32.xlu0 %v359_v1  ;;  %2083 = vmatpush3.msra.mxu0 %v396_v10  ;;  %v1979_v41 = vld [vmem:[%s2710_s3 + $0x20] sm:$0xff]  ;;  %p2279_p13 = pneg %p2278_p12  ;;  %s2282_s17 = scalar_lea.vmem %s2281_s0, 256 }
  0x1c   : > { %2084 = vmatprep.subr.mxu0 %v2338_v8  ;;  %v1989_v61 = vld [vmem:[%s2710_s3 + $0x40] sm:$0xff]  ;;  %p2283_p0 = scmp.lt.s32.totalorder %s1907_s20, %s2281_s0  ;;  %p2284_p1 = scmp.lt.s32.totalorder %s2282_s17, %s2276_s28 }
  0x1d   : > { %2085 = vmatpush3.msra.mxu0 %v395_v11 }
  0x1e   : > { %2115 = vmatprep.subr.mxu0 %v2338_v8  ;;  %p2285_p2 = por %p2284_p1, %p2283_p0 }
  0x20   : > { %p2286_p3 = pnand %p2285_p2, %p2279_p13 }
  0xa4   : > { %v361_v2 = vpop.xlane.xlu0 %360 }
  0xa5   : > { %v363_v3 = vmul.f32 0.03125, %v361_v2 }
  0xa7   : > { %v364_v4 = vsub.f32 %v2449_v0, %v363_v3 }
  0xa9   : > { %v365_v5 = vmul.f32 %v364_v4, %v364_v4 }
  0xab   : > { %v366_v6 = vsel %vm358_vm0, %v365_v5, 0.0 }
  0xac   : > { %367 = vadd.xlane.f32.xlu0 %v366_v6 }
 0x135   : > { %v368_v12 = vpop.xlane.xlu0 %367 }
 0x136   : > { %v369_v13 = vmul.f32 0.03125, %v368_v12 }
 0x138   : > { %v370_v14 = vadd.f32 1e-05, %v369_v13 }
 0x13a   : > { %2256 = vrsqrt.f32 %v370_v14 }
 0x147   : > { %v2257_v15 = vpop.eup %2256 }
 0x148   : > { %v372_v17 = vmul.f32 %v2257_v15, %v364_v4  ;;  %v1973_v4 = vld [vmem:[%s2712_s5] ss:$0 sm:$0xff] }
 0x149   : > { %v394_v5 = vadd.f32 %v1973_v4, %v2449_v0 }
 0x14a   : > { %v379_v19 = vmul.f32 %v1971_v16, %v372_v17 }
 0x14c   : > { %v2483_v20 = vadd.f32 %v1972_v18, %v379_v19 }
 0x14e   : > { %2087 = vmatmul.mubr.msk.f32.vlgmr.msra.gmra.mxu0 %vm358_vm0, %v2483_v20 }
 0x14f   : > { %2117 = vmatprep.mubr.msk.f32.mxu0 %vm2339_vm1, %v2338_v8 }
 0x20e   : > { %v468_v21 = vpop.f32.mrf.mxu0 }
 0x20f   : > { %2090 = vmatpush3.xpose.msk.msra.mxu1 %vm472_vm2, %v468_v21 }
 0x210   : > { %v2088_v22 = vpop.f32.mrf.mxu0  ;;  %2094 = vmatprep.subr.mxu1 %v2338_v8 }
 0x212   : > { %2092 = vmatmul.mubr.msk.f32.vlgmr.msra.gmra.mxu1 %vm472_vm2, %v468_v21 }
 0x213   : > { %2095 = vmatpush3.msra.mxu1 %v468_v21  ;;  %2096 = vmatprep.mubr.msk.f32.mxu1 %vm2339_vm1, %v2338_v8 }
 0x214   : > { %2099 = vmatprep.subr.mxu1 %v2338_v8 }
 0x2d2   : > { %v542_v23 = vpop.f32.mrf.mxu1 }
 0x2d3   : > { %v546_v24 = vmul.f32 0.35355338, %v542_v23  ;;  %v2002_v23 = vld [vmem:[%s2710_s3 + $0x78] sm:$0xff] }
 0x2d4   : > { %v2093_v25 = vpop.f32.mrf.mxu1 }
 0x2d5   : > { %v547_v26 = vsel %vm472_vm2, %v546_v24, -inf  ;;  %v2000_v25 = vld [vmem:[%s2710_s3 + $0x68] sm:$0xff] }
 0x2d6   : > { %548 = vmax.xlane.f32.xlu1 %v547_v26  ;;  %v1999_v26 = vld [vmem:[%s2710_s3 + $0x60] sm:$0xff] }
 0x35f   : > { %v549_v27 = vpop.xlane.xlu1 %548 }
 0x360   : > { %v550_v28 = vsub.f32 %v546_v24, %v549_v27  ;;  %v2001_v24 = vld [vmem:[%s2710_s3 + $0x70] sm:$0xff] }
 0x361   : > { %v1997_v27 = vld [vmem:[%s2711_s4 + $0x10] sm:$0xff] }
 0x362   : > { %v551_v29 = vmul.f32 1.442695, %v550_v28 }
 0x364   : > { %2258 = vpow2.f32 %v551_v29 }
 0x371   : > { %v2259_v30 = vpop.eup %2258 }
 0x372   : > { %v553_v31 = vsel %vm472_vm2, %v2259_v30, 0.0 }
 0x373   : > { %554 = vadd.xlane.f32.xlu1 %v553_v31 }
 0x3fc   : > { %v555_v32 = vpop.xlane.xlu1 %554 }
 0x3fd   : > { %2260 = vrcp.f32 %v555_v32 }
 0x40a   : > { %v2261_v33 = vpop.eup %2260 }
 0x40b   : > { %v557_v34 = vmul.f32 %v2261_v33, %v2259_v30 }
 0x40d   : > { %2097 = vmatmul.mubr.msk.f32.vlgmr.msra.gmra.mxu1 %vm472_vm2, %v557_v34 }
 0x40e   : > { %2100 = vmatpush3.msra.mxu1 %v631_v35  ;;  %2101 = vmatprep.mubr.msk.f32.mxu1 %vm2339_vm1, %v2338_v8 }
 0x40f   : > { %2104 = vmatprep.subr.mxu1 %v2338_v8 }
 0x4cd   : > { %v627_v37 = vpop.f32.mrf.mxu1 }
 0x4ce   : > { %2102 = vmatmul.mubr.msk.f32.vlgmr.msra.gmra.mxu1 %vm472_vm2, %v627_v37 }
 0x4cf   : > { %2105 = vmatpush3.msra.mxu1 %v1982_v36  ;;  %v2098_v39 = vpop.f32.mrf.mxu1  ;;  %2112 = vmatprep.mubr.msk.f32.mxu1 %vm2339_vm1, %v2338_v8 }
 0x4d0   : > { %2106 = vmatprep.subr.mxu1 %v2338_v8 }
 0x4d1   : > { %2107 = vmatpush3.msra.mxu1 %v1981_v38 }
 0x4d2   : > { %2108 = vmatprep.subr.mxu1 %v2338_v8 }
 0x4d3   : > { %2109 = vmatpush3.msra.mxu1 %v1980_v40 }
 0x4d4   : > { %2110 = vmatprep.subr.mxu1 %v2338_v8 }
 0x4d5   : > { %2111 = vmatpush3.msra.mxu1 %v1979_v41 }
 0x4d6   : > { %2113 = vmatmul.mubr.msk.f32.vlgmr.msra.gmra.mxu1 %vm358_vm0, %v2483_v20  ;;  %2125 = vmatprep.subr.mxu1 %v2338_v8 }
 0x4d7   : > { %2127 = vmatprep.mubr.msk.f32.mxu1 %vm2339_vm1, %v2338_v8  ;;  %2126 = vmatpush3.msra.mxu1 %v1987_v62  ;;  %v1742_v62 = vld [vmem:[%s2715_s8 + $0x18] sm:$0xff] }
 0x4d8   : > { %2141 = vmatprep.subr.mxu1 %v2338_v8 }
 0x58e   : > { %v701_v42 = vpop.f32.mrf.mxu1 }
 0x58f   : > { %v705_v6 = vadd.f32 %v701_v42, %v394_v5 }
 0x590   : > { %v2103_v43 = vpop.f32.mrf.mxu1 }
 0x591   : > { %v2007_v43 = vld [vmem:[%s2711_s4 + $0x18] sm:$0xff] }
 0x596   : > { %v777_v44 = vpop.f32.mrf.mxu1 }
 0x597   : > { %2116 = vmatpush3.xpose.msk.msra.mxu0 %vm472_vm2, %v777_v44 }
 0x598   : > { %v2114_v45 = vpop.f32.mrf.mxu1  ;;  %2120 = vmatprep.subr.mxu0 %v2338_v8 }
 0x59a   : > { %2118 = vmatmul.mubr.msk.f32.vlgmr.msra.gmra.mxu0 %vm472_vm2, %v777_v44 }
 0x59b   : > { %2121 = vmatpush3.msra.mxu0 %v777_v44  ;;  %2122 = vmatprep.mubr.msk.f32.mxu0 %vm2339_vm1, %v2338_v8 }
 0x59c   : > { %2130 = vmatprep.subr.mxu0 %v2338_v8 }
 0x65a   : > { %v850_v46 = vpop.f32.mrf.mxu0 }
 0x65b   : > { %v854_v47 = vmul.f32 0.35355338, %v850_v46 }
 0x65c   : > { %v2119_v48 = vpop.f32.mrf.mxu0 }
 0x65d   : > { %v855_v49 = vsel %vm472_vm2, %v854_v47, -inf }
 0x65e   : > { %856 = vmax.xlane.f32.xlu0 %v855_v49 }
 0x6e7   : > { %v857_v50 = vpop.xlane.xlu0 %856 }
 0x6e8   : > { %v858_v51 = vsub.f32 %v854_v47, %v857_v50 }
 0x6ea   : > { %v859_v52 = vmul.f32 1.442695, %v858_v51 }
 0x6ec   : > { %2262 = vpow2.f32 %v859_v52 }
 0x6f9   : > { %v2263_v53 = vpop.eup %2262 }
 0x6fa   : > { %v861_v54 = vsel %vm472_vm2, %v2263_v53, 0.0 }
 0x6fb   : > { %862 = vadd.xlane.f32.xlu1 %v861_v54 }
 0x784   : > { %v863_v55 = vpop.xlane.xlu1 %862 }
 0x785   : > { %2264 = vrcp.f32 %v863_v55 }
 0x792   : > { %v2265_v56 = vpop.eup %2264 }
 0x793   : > { %v865_v57 = vmul.f32 %v2265_v56, %v2263_v53 }
 0x795   : > { %2123 = vmatmul.mubr.msk.f32.vlgmr.msra.gmra.mxu0 %vm472_vm2, %v865_v57 }
 0x796   : > { %2131 = vmatpush3.msra.mxu0 %v1992_v58  ;;  %2138 = vmatprep.mubr.msk.f32.mxu0 %vm2339_vm1, %v2338_v8  ;;  %v1665_v58 = vld [vmem:[%s2716_s9 + $0x18] sm:$0xff] }
 0x797   : > { %2132 = vmatprep.subr.mxu0 %v2338_v8 }
 0x798   : > { %2133 = vmatpush3.msra.mxu0 %v1991_v59  ;;  %v1664_v59 = vld [vmem:[%s2716_s9 + $0x10] sm:$0xff] }
 0x799   : > { %2134 = vmatprep.subr.mxu0 %v2338_v8 }
 0x79a   : > { %2135 = vmatpush3.msra.mxu0 %v1990_v60  ;;  %v1663_v60 = vld [vmem:[%s2716_s9 + $0x8] sm:$0xff] }
 0x79b   : > { %2136 = vmatprep.subr.mxu0 %v2338_v8 }
 0x79c   : > { %2137 = vmatpush3.msra.mxu0 %v1989_v61  ;;  %v1662_v61 = vld [vmem:[%s2716_s9] sm:$0xff] }
 0x79d   : > { %2139 = vmatmul.mubr.msk.f32.vlgmr.msra.gmra.mxu0 %vm358_vm0, %v2483_v20  ;;  %2151 = vmatprep.subr.mxu0 %v2338_v8 }
 0x79e   : > { %2153 = vmatprep.mubr.msk.f32.mxu0 %vm2339_vm1, %v2338_v8  ;;  %2152 = vmatpush3.msra.mxu0 %v1997_v27 }
 0x79f   : > { %2167 = vmatprep.subr.mxu0 %v2338_v8 }
 0x855   : > { %v935_v63 = vpop.f32.mrf.mxu0 }
 0x856   : > { %2128 = vmatmul.mubr.msk.f32.vlgmr.msra.gmra.mxu1 %vm472_vm2, %v935_v63  ;;  %v1741_v63 = vld [vmem:[%s2715_s8 + $0x10] sm:$0xff] }
 0x857   : > { %v2124_v1 = vpop.f32.mrf.mxu0  ;;  %2143 = vmatprep.mubr.msk.f32.mxu1 %vm2339_vm1, %v2338_v8 }
 0x858   : > { %v1740_v1 = vld [vmem:[%s2715_s8 + $0x8] sm:$0xff] }
 0x85d   : > { %v1086_v2 = vpop.f32.mrf.mxu0 }
 0x85e   : > { %2142 = vmatpush3.xpose.msk.msra.mxu1 %vm472_vm2, %v1086_v2 }
 0x85f   : > { %v2140_v3 = vpop.f32.mrf.mxu0  ;;  %2146 = vmatprep.subr.mxu1 %v2338_v8 }
 0x861   : > { %2144 = vmatmul.mubr.msk.f32.vlgmr.msra.gmra.mxu1 %vm472_vm2, %v1086_v2 }
 0x862   : > { %2147 = vmatpush3.msra.mxu1 %v1086_v2  ;;  %2148 = vmatprep.mubr.msk.f32.mxu1 %vm2339_vm1, %v2338_v8  ;;  %v1739_v2 = vld [vmem:[%s2715_s8] sm:$0xff] }
 0x863   : > { %2156 = vmatprep.subr.mxu1 %v2338_v8 }
 0x916   : > { %v1010_v7 = vpop.f32.mrf.mxu1 }
 0x917   : > { %v1014_v9 = vadd.f32 %v1010_v7, %v705_v6  ;;  %v2009_v7 = vld [vmem:[%s2713_s6] ss:$0 sm:$0xff] }
 0x918   : > { %v2129_v10 = vpop.f32.mrf.mxu1 }
 0x919   : > { %v2010_v10 = vld [vmem:[%s2714_s7] ss:$0 sm:$0xff] }
 0x921   : > { %v1159_v11 = vpop.f32.mrf.mxu1 }
 0x922   : > { %v1163_v12 = vmul.f32 0.35355338, %v1159_v11 }
 0x923   : > { %v2145_v13 = vpop.f32.mrf.mxu1 }
 0x924   : > { %v1164_v14 = vsel %vm472_vm2, %v1163_v12, -inf }
 0x925   : > { %1165 = vmax.xlane.f32.xlu0 %v1164_v14 }
 0x9ae   : > { %v1166_v15 = vpop.xlane.xlu0 %1165 }
 0x9af   : > { %v1167_v16 = vsub.f32 %v1163_v12, %v1166_v15 }
 0x9b1   : > { %v1168_v17 = vmul.f32 1.442695, %v1167_v16 }
 0x9b3   : > { %2266 = vpow2.f32 %v1168_v17 }
 0x9c0   : > { %v2267_v18 = vpop.eup %2266 }
 0x9c1   : > { %v1170_v19 = vsel %vm472_vm2, %v2267_v18, 0.0 }
 0x9c2   : > { %1171 = vadd.xlane.f32.xlu1 %v1170_v19 }
 0xa4b   : > { %v1172_v21 = vpop.xlane.xlu1 %1171 }
 0xa4c   : > { %2268 = vrcp.f32 %v1172_v21 }
 0xa59   : > { %v2269_v0 = vpop.eup %2268 }
 0xa5a   : > { %v1174_v22 = vmul.f32 %v2269_v0, %v2267_v18 }
 0xa5c   : > { %2149 = vmatmul.mubr.msk.f32.vlgmr.msra.gmra.mxu1 %vm472_vm2, %v1174_v22 }
 0xa5d   : > { %2157 = vmatpush3.msra.mxu1 %v2002_v23  ;;  %2164 = vmatprep.mubr.msk.f32.mxu1 %vm2339_vm1, %v2338_v8 }
 0xa5e   : > { %2158 = vmatprep.subr.mxu1 %v2338_v8 }
 0xa5f   : > { %2159 = vmatpush3.msra.mxu1 %v2001_v24 }
 0xa60   : > { %2160 = vmatprep.subr.mxu1 %v2338_v8 }
 0xa61   : > { %2161 = vmatpush3.msra.mxu1 %v2000_v25 }
 0xa62   : > { %2162 = vmatprep.subr.mxu1 %v2338_v8 }
 0xa63   : > { %2163 = vmatpush3.msra.mxu1 %v1999_v26 }
 0xa64   : > { %2165 = vmatmul.mubr.msk.f32.vlgmr.msra.gmra.mxu1 %vm358_vm0, %v2483_v20  ;;  %2177 = vmatprep.subr.mxu1 %v2338_v8 }
 0xa65   : > { %2179 = vmatprep.mubr.msk.f32.mxu1 %vm2339_vm1, %v2338_v8  ;;  %2178 = vmatpush3.msra.mxu1 %v2007_v43 }
 0xa66   : > { %2193 = vmatprep.subr.mxu1 %v2338_v8 }
 0xb1c   : > { %v1244_v28 = vpop.f32.mrf.mxu1 }
 0xb1d   : > { %2154 = vmatmul.mubr.msk.f32.vlgmr.msra.gmra.mxu0 %vm472_vm2, %v1244_v28 }
 0xb1e   : > { %v2150_v29 = vpop.f32.mrf.mxu1  ;;  %2169 = vmatprep.mubr.msk.f32.mxu0 %vm2339_vm1, %v2338_v8 }
 0xb24   : > { %v1395_v20 = vpop.f32.mrf.mxu1 }
 0xb25   : > { %2168 = vmatpush3.xpose.msk.msra.mxu0 %vm472_vm2, %v1395_v20 }
 0xb26   : > { %v2166_v30 = vpop.f32.mrf.mxu1  ;;  %2172 = vmatprep.subr.mxu0 %v2338_v8 }
 0xb28   : > { %2170 = vmatmul.mubr.msk.f32.vlgmr.msra.gmra.mxu0 %vm472_vm2, %v1395_v20 }
 0xb29   : > { %2173 = vmatpush3.msra.mxu0 %v1395_v20  ;;  %2174 = vmatprep.mubr.msk.f32.mxu0 %vm2339_vm1, %v2338_v8 }
 0xb2a   : > { %2182 = vmatprep.subr.mxu0 %v2338_v8 }
 0xbdd   : > { %v1319_v31 = vpop.f32.mrf.mxu0 }
 0xbde   : > { %v1323_v32 = vadd.f32 %v1319_v31, %v1014_v9 }
 0xbdf   : > { %v2155_v33 = vpop.f32.mrf.mxu0 }
 0xbe8   : > { %v1468_v34 = vpop.f32.mrf.mxu0 }
 0xbe9   : > { %v1472_v35 = vmul.f32 0.35355338, %v1468_v34 }
 0xbea   : > { %v2171_v36 = vpop.f32.mrf.mxu0 }
 0xbeb   : > { %v1473_v37 = vsel %vm472_vm2, %v1472_v35, -inf }
 0xbec   : > { %1474 = vmax.xlane.f32.xlu0 %v1473_v37 }
 0xc75   : > { %v1475_v38 = vpop.xlane.xlu0 %1474 }
 0xc76   : > { %v1476_v39 = vsub.f32 %v1472_v35, %v1475_v38 }
 0xc78   : > { %v1477_v40 = vmul.f32 1.442695, %v1476_v39 }
 0xc7a   : > { %2270 = vpow2.f32 %v1477_v40 }
 0xc87   : > { %v2271_v41 = vpop.eup %2270 }
 0xc88   : > { %v1479_v42 = vsel %vm472_vm2, %v2271_v41, 0.0 }
 0xc89   : > { %1480 = vadd.xlane.f32.xlu1 %v1479_v42 }
 0xd12   : > { %v1481_v44 = vpop.xlane.xlu1 %1480 }
 0xd13   : > { %2272 = vrcp.f32 %v1481_v44 }
 0xd20   : > { %v2273_v45 = vpop.eup %2272 }
 0xd21   : > { %v1483_v46 = vmul.f32 %v2273_v45, %v2271_v41 }
 0xd23   : > { %2175 = vmatmul.mubr.msk.f32.vlgmr.msra.gmra.mxu0 %vm472_vm2, %v1483_v46 }
 0xd24   : > { %2190 = vmatprep.mubr.msk.f32.mxu0 %vm2339_vm1, %v2338_v8  ;;  %2183 = vmatpush3.msra.mxu0 %v1665_v58 }
 0xd25   : > { %2184 = vmatprep.subr.mxu0 %v2338_v8 }
 0xd26   : > { %2185 = vmatpush3.msra.mxu0 %v1664_v59 }
 0xd27   : > { %2186 = vmatprep.subr.mxu0 %v2338_v8 }
 0xd28   : > { %2187 = vmatpush3.msra.mxu0 %v1663_v60 }
 0xd29   : > { %2188 = vmatprep.subr.mxu0 %v2338_v8 }
 0xd2a   : > { %2189 = vmatpush3.msra.mxu0 %v1662_v61 }
 0xd2b   : > { %2204 = vmatprep.subr.mxu0 %v2338_v8 }
 0xde3   : > { %v1553_v47 = vpop.f32.mrf.mxu0 }
 0xde4   : > { %2180 = vmatmul.mubr.msk.f32.vlgmr.msra.gmra.mxu1 %vm472_vm2, %v1553_v47 }
 0xde5   : > { %v2176_v48 = vpop.f32.mrf.mxu0  ;;  %2201 = vmatprep.mubr.msk.f32.mxu1 %vm2339_vm1, %v2338_v8  ;;  %2194 = vmatpush3.msra.mxu1 %v1742_v62 }
 0xde6   : > { %2195 = vmatprep.subr.mxu1 %v2338_v8 }
 0xde7   : > { %2196 = vmatpush3.msra.mxu1 %v1741_v63 }
 0xde8   : > { %2197 = vmatprep.subr.mxu1 %v2338_v8 }
 0xde9   : > { %2198 = vmatpush3.msra.mxu1 %v1740_v1 }
 0xdea   : > { %2199 = vmatprep.subr.mxu1 %v2338_v8 }
 0xdeb   : > { %2200 = vmatpush3.msra.mxu1 %v1739_v2 }
 0xea4   : > { %v1628_v49 = vpop.f32.mrf.mxu1 }
 0xea5   : > { %v1632_v50 = vadd.f32 %v1628_v49, %v1323_v32 }
 0xea6   : > { %v2181_v51 = vpop.f32.mrf.mxu1 }
 0xea7   : > { %v1635_v52 = vsel %vm358_vm0, %v1632_v50, 0.0 }
 0xea8   : > { %1636 = vadd.xlane.f32.xlu0 %v1635_v52 }
 0xf31   : > { %v1637_v53 = vpop.xlane.xlu0 %1636 }
 0xf32   : > { %v1638_v54 = vmul.f32 0.03125, %v1637_v53 }
 0xf34   : > { %v1639_v55 = vsub.f32 %v1632_v50, %v1638_v54 }
 0xf36   : > { %v1640_v56 = vmul.f32 %v1639_v55, %v1639_v55 }
 0xf38   : > { %v1641_v57 = vsel %vm358_vm0, %v1640_v56, 0.0 }
 0xf39   : > { %1642 = vadd.xlane.f32.xlu1 %v1641_v57 }
 0xfc2   : > { %v1643_v3 = vpop.xlane.xlu1 %1642 }
 0xfc3   : > { %v1644_v4 = vmul.f32 0.03125, %v1643_v3 }
 0xfc5   : > { %v1645_v5 = vadd.f32 1e-05, %v1644_v4 }
 0xfc7   : > { %2274 = vrsqrt.f32 %v1645_v5 }
 0xfd4   : > { %v2275_v6 = vpop.eup %2274 }
 0xfd5   : > { %v1647_v9 = vmul.f32 %v2275_v6, %v1639_v55 }
 0xfd7   : > { %v1654_v11 = vmul.f32 %v2009_v7, %v1647_v9 }
 0xfd9   : > { %v1661_v12 = vadd.f32 %v2010_v10, %v1654_v11 }
 0xfdb   : > { %2191 = vmatmul.mubr.msk.f32.vlgmr.msra.gmra.mxu0 %vm358_vm0, %v1661_v12 }
 0xfdc   : > { %2205 = vmatpush3.msra.mxu0 %v1742_v62  ;;  %2212 = vmatprep.mubr.msk.f32.mxu0 %vm2339_vm1, %v2338_v8 }
 0xfdd   : > { %2206 = vmatprep.subr.mxu0 %v2338_v8 }
 0xfde   : > { %2207 = vmatpush3.msra.mxu0 %v1741_v63 }
 0xfdf   : > { %2208 = vmatprep.subr.mxu0 %v2338_v8 }
 0xfe0   : > { %2209 = vmatpush3.msra.mxu0 %v1740_v1 }
 0xfe1   : > { %2210 = vmatprep.subr.mxu0 %v2338_v8 }
 0xfe2   : > { %2211 = vmatpush3.msra.mxu0 %v1739_v2 }
 0xfe3   : > { %2213 = vmatmul.mubr.msk.f32.vlgmr.msra.gmra.mxu0 %vm358_vm0, %v1661_v12 }
0x109b   : > { %v1735_v13 = vpop.f32.mrf.mxu0 }
0x109c   : > { %2202 = vmatmul.mubr.msk.f32.vlgmr.msra.gmra.mxu1 %vm358_vm0, %v1735_v13 }
0x109d   : > { %v2192_v14 = vpop.f32.mrf.mxu0 }
0x10a3   : > { %v1882_v15 = vpop.f32.mrf.mxu0 }
0x10a5   : > { %v2214_v16 = vpop.f32.mrf.mxu0 }
0x115c   : > { %v1812_v17 = vpop.f32.mrf.mxu1 }
0x115d   : > { %v1886_v18 = vsub.f32 %v1882_v15, %v1812_v17 }
0x115e   : > { %v2203_v19 = vpop.f32.mrf.mxu1 }
0x115f   : > { %v1887_v21 = vmul.f32 0.1, %v1886_v18 }
0x1161   : > { %v2014_v0 = vadd.f32 -0.5, %v1887_v21 }
0x1163   : > { %v1889_v8 = vadd.f32 %v2014_v0, %v1661_v12 }
0x1165   : > { %v1890_v22 = vmax.f32 %v1889_v8, 0.0 }
0x1167   : > { %1891 = vst.msk [vmem:[%s350_s18] sm:$0xff] %vm358_vm0, %v1890_v22 }
0x1168   : > { %2289 = shalt.err (!%p2286_p3)
}
0x1169   : > { %s2290_s11 = scalar_lea.hbm %s1904_s26, 128  ;;  %s2294_s18 = scalar_lea.hbm %s2717_s10, 256 }
0x116a   : > { %p2291_p4 = scmp.ne.s32.totalorder %s1904_s26, %s2290_s11  ;;  %p2295_p9 = scmp.lt.s32.totalorder %s1904_s26, %s2717_s10 }
0x116b   : > { %p2296_p10 = scmp.lt.s32.totalorder %s2294_s18, %s2290_s11 }
0x116c   : > { %p2292_p7 = pnand %p2291_p4, %p2434_p5 }
0x116d   : > { %p2297_p11 = por %p2296_p10, %p2295_p9 }
0x116e   : > { %p2293_p8 = pneg %p2292_p7 }
0x1170   : > { %p2298_p12 = pnand %p2297_p11, %p2293_p8 }
0x1172   : > { %2301 = shalt.err (!%p2298_p12)
}
0x1173   : > { %2215 = dma.vmem_to_hbm [thread:$0]  (%p2434_p5), %s1907_s20, 128, %s1904_s26, %s1893_s27  }
0x1174 PF: > { %p2221_p13 = scmp.ge.s32.totalorder %s2336_s16, 2  ;;  %s1918_s0 = sand.u32 1, %s2324_s13  }
0x1175   : > { %s1919_s28 = scalar_lea.sflag [#allocation3], %s1918_s0 }
0x1176   : > { %p2218_p0 = pnand %p2221_p13, %p2438_p6 }
0x1178   : > { %p2219_p1 = pneg %p2218_p0 }
0x117a   : > { %2319 = dma.done.wait (%p2219_p1), %s1919_s28, 128  }
0x117b   : > { %2321 = vsyncadd (%p2219_p1), %s1919_s28, 4294967168  ;;  %p20_p2 = scmp.ge.s32.totalorder %s2421_s19, 4   ;;  %s2722_s13 = smov %s2328_s14 }
0x117c   : > { %s2723_s14 = smov %s2332_s15  ;;  %s2724_s15 = smov %s2432_s22 }
0x117d   : > { %s2725_s16 = smov %s2421_s19  ;;  %22 = sbr.rel (!%p20_p2) target bundleno = 5 (0x5), region = 101 }
0x1182   :  { %1924 = vsyncpa [#allocation3], 1 }
0x1183   :  { %1926 = vsyncpa [#allocation3 + $0x1], 1 }

</bundles_post_ra>
